<compile_context>
chip_gen: v7x
topology: tpu7x:2x2x1
jax: 0.10.0
libtpu: 0.0.40
codegen_flags: <defaults>
</compile_context>

<pallas_src>
import functools

import jax
import jax.numpy as jnp
from jax.experimental import pallas as pl
from jax.experimental.pallas import tpu as pltpu


def _round_up(x, m):
    return ((x + m - 1) // m) * m


def _model_kernel(xin_ref, a_ref, w1t_ref, out_ref):
    """xin: [8, TL]   rows 0-2 features, row 3 = 1.0, row 4 = index, rows 5-7 zero
    a:   [128, 8]  fc weight (cols 0-2 = Wfc^T, col 3 = fc bias, cols 4-7 = 0;
                   rows 100-127 all zero)
    w1t: [8, 128]  fused head weight (cols 0-99 = fc-half of both heads,
                   cols 100-105 = folded emb@head + head biases, rest zero)
    out: [8, TL]   rows 0-1 regression, rows 2-5 classification, rows 6-7 zero
    """
    x = xin_ref[...]                                                # [8, TL]

    # fc: Linear(3, 100) + bias on the MXU (the 1.0 row picks the bias), ReLU.
    # Rows 100..127 of `a` are zero -> those rows of h stay exactly 0 after ReLU.
    h = jnp.dot(a_ref[...], x, preferred_element_type=jnp.float32)  # [128, TL]
    h = jnp.maximum(h, 0.0)

    # One-hot of the embedding index dropped into the dead rows 100..105 so a
    # SINGLE MXU matmul produces fc-half + embedding-half + biases of both heads.
    idx = xin_ref[4:5, :].astype(jnp.int32)                         # [1, TL]
    rows = jax.lax.broadcasted_iota(jnp.int32, h.shape, 0)          # [128, TL]
    onehot = (rows == idx + 100).astype(jnp.float32)                # [128, TL]

    out = jnp.dot(w1t_ref[...], h + onehot,
                  preferred_element_type=jnp.float32)               # [8, TL]
    out_ref[...] = out.astype(out_ref.dtype)


def init_params(key):
    """Deterministic parameter init matching the torch module's shapes
    (linear weights stored pre-transposed as [in, out])."""
    ks = jax.random.split(key, 7)
    emb = jax.random.normal(ks[0], (6, 100), jnp.float32)                       # nn.Embedding(6,100)
    wfc = jax.random.uniform(ks[1], (3, 100), jnp.float32, -1.0, 1.0) / jnp.sqrt(3.0)
    bfc = jax.random.uniform(ks[2], (1, 100), jnp.float32, -1.0, 1.0) / jnp.sqrt(3.0)
    wr = jax.random.uniform(ks[3], (200, 2), jnp.float32, -1.0, 1.0) / jnp.sqrt(200.0)
    br = jax.random.uniform(ks[4], (1, 2), jnp.float32, -1.0, 1.0) / jnp.sqrt(200.0)
    wc = jax.random.uniform(ks[5], (200, 4), jnp.float32, -1.0, 1.0) / jnp.sqrt(200.0)
    bc = jax.random.uniform(ks[6], (1, 4), jnp.float32, -1.0, 1.0) / jnp.sqrt(200.0)
    return dict(emb=emb, wfc=wfc, bfc=bfc, wr=wr, br=br, wc=wc, bc=bc)


def prepare_params(params):
    """One-time (init-time) weight folding/packing for the kernel."""
    # fc weight for the transposed MXU matmul: [128, 8].
    a = jnp.zeros((128, 8), jnp.float32)
    a = a.at[:100, 0:3].set(params["wfc"].T)             # Wfc^T
    a = a.at[:100, 3].set(params["bfc"][0])              # fc bias (picked by 1.0 row)

    # Fused head weight: [8, 128].
    w_fc_half = jnp.concatenate([params["wr"][:100], params["wc"][:100]], axis=1)   # [100, 6]
    w_emb_half = jnp.concatenate([params["wr"][100:], params["wc"][100:]], axis=1)  # [100, 6]
    bias = jnp.concatenate([params["br"], params["bc"]], axis=1)                    # [1, 6]
    embh = params["emb"] @ w_emb_half + bias                                        # [6, 6]
    w1t = jnp.zeros((8, 128), jnp.float32)
    w1t = w1t.at[:6, :100].set(w_fc_half.T)               # fc half of both heads
    w1t = w1t.at[:6, 100:106].set(embh.T)                 # folded emb half + biases
    return dict(a=a, w1t=w1t)


@functools.partial(jax.jit, static_argnames=("tb",))
def model_forward(float_input, long_input, prep, *, tb=8192):
    """float_input: [B, 3] f32, long_input: [B] int. Returns ([B, 2], [B, 4])."""
    assert tb % 128 == 0
    B = float_input.shape[0]

    # Batch tile (lane axis): as large as possible to amortize per-step grid
    # overhead.  ~1.7 KiB VMEM / example at this layout -> TL=8192 needs
    # ~14 MiB, well under the 48 MiB limit set below (which itself fits
    # v5e (128 MiB), v6e (128 MiB) and v7x (64 MiB) physical VMEM).
    TL = min(tb, _round_up(B, 128))
    Bp = _round_up(B, TL)

    # Single input-packing pass: [8, Bp] slab, batch on the 128-lane axis.
    xin = jnp.concatenate(
        [float_input.astype(jnp.float32),
         jnp.ones((B, 1), jnp.float32),                     # bias picker (must be 1.0)
         long_input.astype(jnp.float32).reshape(B, 1),      # index (exact: vocab = 6)
         jnp.zeros((B, 3), jnp.float32)], axis=1)           # [B, 8]
    if Bp != B:
        xin = jnp.pad(xin, ((0, Bp - B), (0, 0)))           # padded rows: idx 0, sliced off below
    xint = xin.T                                            # [8, Bp], lane-dense

    outt = pl.pallas_call(
        _model_kernel,
        out_shape=jax.ShapeDtypeStruct((8, Bp), jnp.float32),
        grid_spec=pltpu.PrefetchScalarGridSpec(
            num_scalar_prefetch=0,
            grid=(Bp // TL,),
            in_specs=[
                pl.BlockSpec((8, TL), lambda i: (0, i)),    # packed activations
                pl.BlockSpec((128, 8), lambda i: (0, 0)),   # fc weight + bias
                pl.BlockSpec((8, 128), lambda i: (0, 0)),   # fused head weight
            ],
            out_specs=pl.BlockSpec((8, TL), lambda i: (0, i)),
        ),
        compiler_params=pltpu.CompilerParams(
            dimension_semantics=("parallel",),              # megacore sharding on v7x
            vmem_limit_bytes=48 * 1024 * 1024,
        ),
    )(xint, prep["a"], prep["w1t"])

    # Layout plumbing only: un-transpose / split the fused output slab.
    reg = outt[0:2, :B].T                                   # [B, 2]
    cls = outt[2:6, :B].T                                   # [B, 4]
    return reg, cls


def _reference(float_input, long_input, params):
    """Pure-JAX reference mirroring the torch forward exactly."""
    x = jnp.maximum(float_input @ params["wfc"] + params["bfc"], 0.0)
    y = params["emb"][long_input]
    result = jnp.concatenate([x, y], axis=-1)
    return (result @ params["wr"] + params["br"],
            result @ params["wc"] + params["bc"])


if __name__ == "__main__":
    key = jax.random.PRNGKey(0)
    k_p, k_f, k_l = jax.random.split(key, 3)

    B = 8
    params = init_params(k_p)
    prep = prepare_params(params)
    float_input = jax.random.normal(k_f, (B, 3), jnp.float32)
    long_input = jax.random.randint(k_l, (B,), 0, 6, jnp.int32)

    reg, cls = model_forward(float_input, long_input, prep)
    jax.block_until_ready((reg, cls))

    reg_ref, cls_ref = _reference(float_input, long_input, params)
    assert reg.shape == (B, 2) and cls.shape == (B, 4)
    assert jnp.allclose(reg, reg_ref, atol=1e-4, rtol=1e-4)
    assert jnp.allclose(cls, cls_ref, atol=1e-4, rtol=1e-4)

    print("KERNEL_OK")
</pallas_src>

<mosaic_0001>
module attributes {stable_mosaic.version = 11 : i64} {
  func.func @_model_kernel(%arg0: i32, %arg1: memref<8x128xf32, #tpu.memory_space<vmem>>, %arg2: memref<128x8xf32, #tpu.memory_space<vmem>>, %arg3: memref<8x128xf32, #tpu.memory_space<vmem>>, %arg4: memref<8x128xf32, #tpu.memory_space<vmem>>) attributes {dimension_semantics = [#tpu.dimension_semantics<parallel>], iteration_bounds = array<i64: 1>, scalar_prefetch = 0 : i64, scratch_operands = 0 : i64, tpu.core_type = #tpu.core_type<tc>, window_params = [{transform_indices = @transform_0, window_bounds = array<i64: 8, 128>}, {pipeline_mode = #tpu.pipeline_mode<synchronous>, transform_indices = @transform_1, window_bounds = array<i64: 128, 8>}, {pipeline_mode = #tpu.pipeline_mode<synchronous>, transform_indices = @transform_2, window_bounds = array<i64: 8, 128>}, {transform_indices = @transform_3, window_bounds = array<i64: 8, 128>}]} {
    %c0 = arith.constant 0 : index
    %c0_0 = arith.constant 0 : index
    %0 = vector.load %arg1[%c0, %c0_0] : memref<8x128xf32, #tpu.memory_space<vmem>>, vector<8x128xf32>
    %c0_1 = arith.constant 0 : index
    %c0_2 = arith.constant 0 : index
    %1 = vector.load %arg2[%c0_1, %c0_2] : memref<128x8xf32, #tpu.memory_space<vmem>>, vector<128x8xf32>
    %cst = arith.constant dense<0.000000e+00> : vector<128x128xf32>
    %2 = tpu.matmul %1, %0, %cst {dimension_numbers = #tpu.dot_dimension_numbers<[1], [0], [0], [1], [0, 0, 1, 1], [], []>} : vector<128x8xf32>, vector<8x128xf32>, vector<128x128xf32> -> vector<128x128xf32>
    %cst_3 = arith.constant 0.000000e+00 : f32
    %3 = vector.broadcast %cst_3 : f32 to vector<128x128xf32>
    %4 = arith.maximumf %2, %3 : vector<128x128xf32>
    %c4 = arith.constant 4 : index
    %c0_4 = arith.constant 0 : index
    %5 = vector.load %arg1[%c4, %c0_4] : memref<8x128xf32, #tpu.memory_space<vmem>>, vector<1x128xf32>
    %6 = arith.fptosi %5 : vector<1x128xf32> to vector<1x128xi32>
    %7 = tpu.iota {dimensions = array<i32: 0>} : vector<128x128xi32>
    %c100_i32 = arith.constant 100 : i32
    %8 = vector.broadcast %c100_i32 : i32 to vector<1x128xi32>
    %9 = arith.addi %6, %8 : vector<1x128xi32>
    %10 = vector.broadcast %9 : vector<1x128xi32> to vector<128x128xi32>
    %11 = arith.cmpi eq, %7, %10 : vector<128x128xi32>
    %12 = arith.extui %11 : vector<128x128xi1> to vector<128x128xi32>
    %13 = arith.sitofp %12 : vector<128x128xi32> to vector<128x128xf32>
    %c0_5 = arith.constant 0 : index
    %c0_6 = arith.constant 0 : index
    %14 = vector.load %arg3[%c0_5, %c0_6] : memref<8x128xf32, #tpu.memory_space<vmem>>, vector<8x128xf32>
    %15 = arith.addf %4, %13 : vector<128x128xf32>
    %cst_7 = arith.constant dense<0.000000e+00> : vector<8x128xf32>
    %16 = tpu.matmul %14, %15, %cst_7 {dimension_numbers = #tpu.dot_dimension_numbers<[1], [0], [0], [1], [0, 0, 1, 1], [], []>} : vector<8x128xf32>, vector<128x128xf32>, vector<8x128xf32> -> vector<8x128xf32>
    %c0_8 = arith.constant 0 : index
    %c0_9 = arith.constant 0 : index
    %17 = vector.load %arg4[%c0_8, %c0_9] : memref<8x128xf32, #tpu.memory_space<vmem>>, vector<8x128xf32>
    tpu.vector_store %arg4[%c0_8, %c0_9], %16 {strides = array<i32>} : memref<8x128xf32, #tpu.memory_space<vmem>>, vector<8x128xf32>,
    return
  }
  func.func @transform_0(%arg0: i32) -> (i32, i32) {
    %c0_i32 = arith.constant 0 : i32
    %c0_i32_0 = arith.constant 0 : i32
    return %c0_i32, %arg0 : i32, i32
  }
  func.func @transform_1(%arg0: i32) -> (i32, i32) {
    %c0_i32 = arith.constant 0 : i32
    %c0_i32_0 = arith.constant 0 : i32
    %c0_i32_1 = arith.constant 0 : i32
    return %c0_i32, %c0_i32_0 : i32, i32
  }
  func.func @transform_2(%arg0: i32) -> (i32, i32) {
    %c0_i32 = arith.constant 0 : i32
    %c0_i32_0 = arith.constant 0 : i32
    %c0_i32_1 = arith.constant 0 : i32
    return %c0_i32, %c0_i32_0 : i32, i32
  }
  func.func @transform_3(%arg0: i32) -> (i32, i32) {
    %c0_i32 = arith.constant 0 : i32
    %c0_i32_0 = arith.constant 0 : i32
    return %c0_i32, %arg0 : i32, i32
  }
}

</mosaic_0001>

<bundles_post_ra>
// kernel: model_forward.1
= control target key start
LH: loop header
LB: loop body
LE: loop exit
PB: predicated region body
PF: predicated region fallthrough
CT: control target
= control target key end

     0   :  { %vm31_vm0 = vcmask 64512   ;;  %v243_v19 = vlaneseq  ;;  %v561_v26 = vmov 0.0   ;;  %v562_v33 = vmov 0.0|0.0   ;;  %s686_s0 = inlined_call_operand.vmem [shape: f32[8,128], index: 0, kind: input, shape index: {}]   ;;  %s687_s1 = inlined_call_operand.vmem [shape: f32[128,8], index: 1, kind: input, shape index: {}]   ;;  %s688_s2 = inlined_call_operand.vmem [shape: f32[8,128], index: 2, kind: input, shape index: {}]   ;;  %s689_s3 = inlined_call_operand.vmem [shape: f32[8,128], index: 3, kind: output, shape index: {}]  }
   0x1   :  { %v14_v0 = vld [vmem:[%s686_s0] sm:$0xff]  ;;  %v16_v2 = vld [vmem:[%s687_s1 + $0x8] sm:$0xff]  ;;  %v17_v3 = vld [vmem:[%s687_s1 + $0x10] sm:$0xff]  ;;  %532 = vmatprep.subr.bf16.mxu1 %v562_v33 }
   0x2   :  { %v15_v1 = vld [vmem:[%s687_s1] sm:$0xff]  ;;  %471 = vmatprep.subr.mxu0 %v14_v0  ;;  %v18_v4 = vld [vmem:[%s687_s1 + $0x18] sm:$0xff]  ;;  %v20_v6 = vld [vmem:[%s687_s1 + $0x28] sm:$0xff]  ;;  %v244_v21 = vshrl.u32 %v243_v19, 7 }
   0x3   :  { %473 = vmatprep.mubr.msk.f32.mxu0 %vm31_vm0, %v15_v1  ;;  %472 = vmatpush3.msra.mxu0 %v14_v0  ;;  %v19_v5 = vld [vmem:[%s687_s1 + $0x20] sm:$0xff]  ;;  %v21_v7 = vld [vmem:[%s687_s1 + $0x30] sm:$0xff]  ;;  %v22_v8 = vld [vmem:[%s687_s1 + $0x38] sm:$0xff] }
   0x4   :  { %474 = vmatmul.mubr.msk.f32.vlgmr.msra.gmra.mrb[0].mxu0 %vm31_vm0, %v16_v2  ;;  %v23_v9 = vld [vmem:[%s687_s1 + $0x40] sm:$0xff]  ;;  %v24_v10 = vld [vmem:[%s687_s1 + $0x48] sm:$0xff]  ;;  %v25_v11 = vld [vmem:[%s687_s1 + $0x50] sm:$0xff]  ;;  %v263_v23 = vsub.s32 0, %v244_v21  ;;  %v245_v25 = vadd.s32 8, %v244_v21  ;;  %v247_v29 = vadd.s32 24, %v244_v21 }
   0x5   :  { %476 = vmatprep.mubr.msk.f32.mxu0 %vm31_vm0, %v17_v3  ;;  %v26_v12 = vld [vmem:[%s687_s1 + $0x58] sm:$0xff]  ;;  %v27_v13 = vld [vmem:[%s687_s1 + $0x60] sm:$0xff]  ;;  %v28_v14 = vld [vmem:[%s687_s1 + $0x68] sm:$0xff]  ;;  %v246_v30 = vadd.s32 16, %v244_v21  ;;  %v249_v34 = vadd.s32 40, %v244_v21  ;;  %v248_v35 = vadd.s32 32, %v244_v21 }
   0x6   :  { %v29_v15 = vld [vmem:[%s687_s1 + $0x70] sm:$0xff]  ;;  %v30_v16 = vld [vmem:[%s687_s1 + $0x78] sm:$0xff]  ;;  %v241_v17 = vld [vmem:[%s686_s0 + $0x4] sm:$0x1]  ;;  %v251_v38 = vadd.s32 56, %v244_v21  ;;  %v250_v39 = vadd.s32 48, %v244_v21 }
   0x7   :  { %v556_v18 = vtrunc.f32 %v241_v17  ;;  %v253_v42 = vadd.s32 72, %v244_v21  ;;  %v252_v43 = vadd.s32 64, %v244_v21  ;;  %v255_v46 = vadd.s32 88, %v244_v21 }
   0x8   :  { %477 = vmatmul.mubr.msk.f32.gmra.mrb[2].mxu0 %vm31_vm0, %v18_v4  ;;  %v254_v47 = vadd.s32 80, %v244_v21  ;;  %v257_v50 = vadd.s32 104, %v244_v21  ;;  %v256_v51 = vadd.s32 96, %v244_v21  ;;  %v259_v54 = vadd.s32 120, %v244_v21 }
   0x9   :  { %479 = vmatprep.mubr.msk.f32.mxu0 %vm31_vm0, %v19_v5  ;;  %v557_v20 = vcvt.f32.s32 %v556_v18  ;;  %v258_v55 = vadd.s32 112, %v244_v21 }
   0xb   :  { %v260_v22 = vadd.s32 100, %v557_v20 }
   0xc   :  { %480 = vmatmul.mubr.msk.f32.gmra.mrb[4].mxu0 %vm31_vm0, %v20_v6 }
   0xd   :  { %482 = vmatprep.mubr.msk.f32.mxu0 %vm31_vm0, %v21_v7  ;;  %v264_v24 = vrot.slane %v260_v22, %v263_v23 }
   0xf   :  { %vm266_vm1 = vcmp.eq.s32.totalorder %v245_v25, %v264_v24  ;;  %vm265_vm2 = vcmp.eq.s32.totalorder %v244_v21, %v264_v24  ;;  %vm268_vm3 = vcmp.eq.s32.totalorder %v247_v29, %v264_v24  ;;  %vm267_vm4 = vcmp.eq.s32.totalorder %v246_v30, %v264_v24 }
  0x10   :  { %483 = vmatmul.mubr.msk.f32.gmra.mrb[6].mxu0 %vm31_vm0, %v22_v8  ;;  %v422_v27 = vsel %vm266_vm1, 1.0, %v561_v26  ;;  %v421_v28 = vsel %vm265_vm2, 1.0, %v561_v26  ;;  %v424_v31 = vsel %vm268_vm3, 1.0, %v561_v26  ;;  %v423_v32 = vsel %vm267_vm4, 1.0, %v561_v26 }
  0x11   :  { %485 = vmatprep.mubr.msk.f32.mxu0 %vm31_vm0, %v23_v9  ;;  %vm270_vm5 = vcmp.eq.s32.totalorder %v249_v34, %v264_v24  ;;  %vm269_vm6 = vcmp.eq.s32.totalorder %v248_v35, %v264_v24  ;;  %vm272_vm7 = vcmp.eq.s32.totalorder %v251_v38, %v264_v24  ;;  %vm271_vm8 = vcmp.eq.s32.totalorder %v250_v39, %v264_v24 }
  0x12   :  { %v426_v36 = vsel %vm270_vm5, 1.0, %v561_v26  ;;  %v425_v37 = vsel %vm269_vm6, 1.0, %v561_v26  ;;  %v428_v40 = vsel %vm272_vm7, 1.0, %v561_v26  ;;  %v427_v41 = vsel %vm271_vm8, 1.0, %v561_v26 }
  0x13   :  { %vm274_vm9 = vcmp.eq.s32.totalorder %v253_v42, %v264_v24  ;;  %vm273_vm10 = vcmp.eq.s32.totalorder %v252_v43, %v264_v24  ;;  %vm276_vm11 = vcmp.eq.s32.totalorder %v255_v46, %v264_v24  ;;  %vm275_vm12 = vcmp.eq.s32.totalorder %v254_v47, %v264_v24 }
  0x14   :  { %486 = vmatmul.mubr.msk.f32.gmra.mrb[8].mxu0 %vm31_vm0, %v24_v10  ;;  %v430_v44 = vsel %vm274_vm9, 1.0, %v561_v26  ;;  %v429_v45 = vsel %vm273_vm10, 1.0, %v561_v26  ;;  %v655_v48 = vsel %vm276_vm11, 1.0, %v561_v26  ;;  %v657_v49 = vsel %vm275_vm12, 1.0, %v561_v26 }
  0x15   :  { %488 = vmatprep.mubr.msk.f32.mxu0 %vm31_vm0, %v25_v11  ;;  %vm278_vm13 = vcmp.eq.s32.totalorder %v257_v50, %v264_v24  ;;  %vm277_vm14 = vcmp.eq.s32.totalorder %v256_v51, %v264_v24  ;;  %vm280_vm15 = vcmp.eq.s32.totalorder %v259_v54, %v264_v24  ;;  %vm563_vm1 = vmmov 0   ;;  %v313_v51 = vld [vmem:[%s688_s2] sm:$0xff] }
  0x16   :  { %v659_v52 = vsel %vm278_vm13, 1.0, %v561_v26  ;;  %v661_v53 = vsel %vm277_vm14, 1.0, %v561_v26  ;;  %v663_v56 = vsel %vm280_vm15, 1.0, %v561_v26  ;;  %529 = vmatprep.mubr.msk.f32.mxu1 %vm563_vm1, %v561_v26 }
  0x18   :  { %489 = vmatmul.mubr.msk.f32.gmra.mrb[10].mxu0 %vm31_vm0, %v26_v12 }
  0x19   :  { %491 = vmatprep.mubr.msk.f32.mxu0 %vm31_vm0, %v27_v13 }
  0x1c   :  { %492 = vmatmul.mubr.msk.f32.gmra.mrb[12].mxu0 %vm31_vm0, %v28_v14 }
  0x1d   :  { %494 = vmatprep.mubr.msk.f32.mxu0 %vm31_vm0, %v29_v15 }
  0x20   :  { %495 = vmatmul.mubr.msk.f32.gmra.mrb[14].mxu0 %vm31_vm0, %v30_v16  ;;  %vm279_vm0 = vcmp.eq.s32.totalorder %v258_v55, %v264_v24 }
  0x21   :  { %v665_v57 = vsel %vm279_vm0, 1.0, %v561_v26 }
  0xd7   :  { %v475_v58 = vpop.f32.mrb[0].mxu0 }
  0xd8   :  { %v226_v59 = vmax.f32 %v475_v58, 0.0  ;;  %v146_v60 = vpop.f32.mrb[1].mxu0 }
  0xd9   :  { %v225_v61 = vmax.f32 %v146_v60, 0.0 }
  0xda   :  { %v315_v62 = vadd.f32 %v422_v27, %v226_v59 }
  0xdb   :  { %v314_v63 = vadd.f32 %v421_v28, %v225_v61  ;;  %v478_v0 = vpop.f32.mrb[2].mxu0 }
  0xdc   :  { %v228_v1 = vmax.f32 %v478_v0, 0.0  ;;  %v156_v2 = vpop.f32.mrb[3].mxu0 }
  0xdd   :  { %v227_v3 = vmax.f32 %v156_v2, 0.0  ;;  %v533_v4 = vpack.c.bf16 %v315_v62, %v314_v63 }
  0xde   :  { %v317_v5 = vadd.f32 %v424_v31, %v228_v1 }
  0xdf   :  { %v316_v6 = vadd.f32 %v423_v32, %v227_v3  ;;  %v481_v7 = vpop.f32.mrb[4].mxu0  ;;  %534 = vmatpush3.bf16.msra.mxu1 %v533_v4 }
  0xe0   :  { %v230_v8 = vmax.f32 %v481_v7, 0.0  ;;  %v166_v9 = vpop.f32.mrb[5].mxu0  ;;  %535 = vmatprep.subr.bf16.mxu1 %v562_v33 }
  0xe1   :  { %v229_v10 = vmax.f32 %v166_v9, 0.0  ;;  %v536_v11 = vpack.c.bf16 %v317_v5, %v316_v6 }
  0xe2   :  { %v319_v12 = vadd.f32 %v426_v36, %v230_v8 }
  0xe3   :  { %v318_v13 = vadd.f32 %v425_v37, %v229_v10  ;;  %v484_v14 = vpop.f32.mrb[6].mxu0  ;;  %537 = vmatpush3.bf16.msra.mxu1 %v536_v11 }
  0xe4   :  { %v232_v15 = vmax.f32 %v484_v14, 0.0  ;;  %v176_v16 = vpop.f32.mrb[7].mxu0  ;;  %538 = vmatprep.subr.bf16.mxu1 %v562_v33 }
  0xe5   :  { %v231_v17 = vmax.f32 %v176_v16, 0.0  ;;  %v539_v18 = vpack.c.bf16 %v319_v12, %v318_v13 }
  0xe6   :  { %v321_v19 = vadd.f32 %v428_v40, %v232_v15 }
  0xe7   :  { %v320_v20 = vadd.f32 %v427_v41, %v231_v17  ;;  %v487_v21 = vpop.f32.mrb[8].mxu0  ;;  %540 = vmatpush3.bf16.msra.mxu1 %v539_v18 }
  0xe8   :  { %v234_v22 = vmax.f32 %v487_v21, 0.0  ;;  %v186_v23 = vpop.f32.mrb[9].mxu0  ;;  %541 = vmatprep.subr.bf16.mxu1 %v562_v33 }
  0xe9   :  { %v233_v24 = vmax.f32 %v186_v23, 0.0  ;;  %v542_v25 = vpack.c.bf16 %v321_v19, %v320_v20 }
  0xea   :  { %v323_v26 = vadd.f32 %v430_v44, %v234_v22 }
  0xeb   :  { %v322_v27 = vadd.f32 %v429_v45, %v233_v24  ;;  %v490_v28 = vpop.f32.mrb[10].mxu0  ;;  %543 = vmatpush3.bf16.msra.mxu1 %v542_v25 }
  0xec   :  { %v236_v29 = vmax.f32 %v490_v28, 0.0  ;;  %v196_v30 = vpop.f32.mrb[11].mxu0  ;;  %544 = vmatprep.subr.bf16.mxu1 %v562_v33 }
  0xed   :  { %v235_v31 = vmax.f32 %v196_v30, 0.0  ;;  %v545_v32 = vpack.c.bf16 %v323_v26, %v322_v27 }
  0xee   :  { %v325_v34 = vadd.f32 %v655_v48, %v236_v29 }
  0xef   :  { %v324_v35 = vadd.f32 %v657_v49, %v235_v31  ;;  %v493_v36 = vpop.f32.mrb[12].mxu0  ;;  %546 = vmatpush3.bf16.msra.mxu1 %v545_v32 }
  0xf0   :  { %v238_v37 = vmax.f32 %v493_v36, 0.0  ;;  %v206_v38 = vpop.f32.mrb[13].mxu0  ;;  %547 = vmatprep.subr.bf16.mxu1 %v562_v33 }
  0xf1   :  { %v237_v39 = vmax.f32 %v206_v38, 0.0  ;;  %v548_v40 = vpack.c.bf16 %v325_v34, %v324_v35 }
  0xf2   :  { %v327_v41 = vadd.f32 %v659_v52, %v238_v37 }
  0xf3   :  { %v326_v42 = vadd.f32 %v661_v53, %v237_v39  ;;  %v496_v43 = vpop.f32.mrb[14].mxu0  ;;  %549 = vmatpush3.bf16.msra.mxu1 %v548_v40 }
  0xf4   :  { %v240_v44 = vmax.f32 %v496_v43, 0.0  ;;  %v216_v45 = vpop.f32.mrb[15].mxu0  ;;  %550 = vmatprep.subr.bf16.mxu1 %v562_v33 }
  0xf5   :  { %v239_v46 = vmax.f32 %v216_v45, 0.0  ;;  %v551_v47 = vpack.c.bf16 %v327_v41, %v326_v42 }
  0xf6   :  { %v329_v48 = vadd.f32 %v663_v56, %v240_v44 }
  0xf7   :  { %v328_v49 = vadd.f32 %v665_v57, %v239_v46  ;;  %552 = vmatpush3.bf16.msra.mxu1 %v551_v47 }
  0xf8   :  { %553 = vmatprep.subr.bf16.mxu1 %v562_v33 }
  0xf9   :  { %v554_v50 = vpack.c.bf16 %v329_v48, %v328_v49 }
  0xfb   :  { %555 = vmatpush3.bf16.msra.mxu1 %v554_v50 }
  0xfe   :  { %530 = vmatmul.mubr.f32.vlgmr.msra.gmra.mrb[0].mxu1 %v313_v51 }
 0x1d1   :  { %v396_v52 = vpop.f32.mrb[0].mxu1 }
 0x1d2   :  { %400 = vst [vmem:[%s689_s3] sm:$0xff] %v396_v52  ;;  %v531_v53 = vpop.f32.mrb[1].mxu1 }

</bundles_post_ra>
